<compile_context>
chip_gen: v6e
topology: v6e:2x2x1
jax: 0.10.0
libtpu: 0.0.40
codegen_flags: <defaults>
</compile_context>

<pallas_src>
import math
from functools import partial

import jax
import jax.numpy as jnp
from jax.experimental import pallas as pl
from jax.experimental.pallas import tpu as pltpu


# -----------------------------------------------------------------------------
# Parameter glue: normalize_weight(weight, eps) / sqrt(fan_in)
# -----------------------------------------------------------------------------
def normalized_linear_weight(weight, eps=1e-4, matmul_dtype=None):
    """weight: (dim_out, dim_in) torch-style Linear weight.

    Returns wT of shape (dim_in, dim_out) such that the forward is x @ wT.
    normalize_weight multiplies by sqrt(numel/dim_out) == sqrt(dim_in) and the
    forward divides by sqrt(fan_in) == sqrt(dim_in), so the effective weight is
    just the row-wise l2-normalized weight (F.normalize: v / max(||v||, eps)).
    """
    norm = jnp.sqrt(jnp.sum(weight * weight, axis=-1, keepdims=True))
    w = weight / jnp.maximum(norm, eps)
    wT = jnp.transpose(w)                       # (dim_in, dim_out)
    if matmul_dtype is not None:
        wT = wT.astype(matmul_dtype)
    return wT


# -----------------------------------------------------------------------------
# Pallas kernel: one tile of rows through the matmul
# -----------------------------------------------------------------------------
def _mp_linear_kernel(x_ref, w_ref, o_ref, *, matmul_dtype):
    x = x_ref[...]
    if matmul_dtype is not None and x.dtype != matmul_dtype:
        x = x.astype(matmul_dtype)              # bf16 inputs -> MXU native
    o_ref[...] = jnp.dot(
        x, w_ref[...], preferred_element_type=jnp.float32
    ).astype(o_ref.dtype)


# -----------------------------------------------------------------------------
# Wrapper
# -----------------------------------------------------------------------------
def _pick_row_tile(n_rows, dim_in, dim_out, x_bytes, w_bytes, out_bytes,
                   tile, vmem_limit_bytes):
    """Largest row tile <= `tile` whose double-buffered working set fits VMEM."""
    tm = max(8, min(tile, n_rows))
    tm = ((tm + 7) // 8) * 8                    # sublane multiple
    budget = int(0.75 * vmem_limit_bytes)
    weight_bytes = 2 * dim_in * dim_out * w_bytes     # double-buffered by default
    while tm > 8:
        working = 2 * tm * dim_in * x_bytes + 2 * tm * dim_out * out_bytes
        if working + weight_bytes <= budget:
            break
        tm = max(8, tm // 2)
    return tm


def mp_linear(x, weight, *, eps=1e-4, tile=512, matmul_dtype=jnp.bfloat16,
              vmem_limit_bytes=64 * 1024 * 1024):
    """Forward of the magnitude-preserving Linear.

    x: (..., dim_in) float32.  weight: (dim_out, dim_in) torch-style.
    """
    *lead, dim_in = x.shape
    dim_out = weight.shape[0]

    wT = normalized_linear_weight(weight, eps=eps, matmul_dtype=matmul_dtype)

    n_rows = math.prod(lead) if lead else 1
    x2 = x.reshape(n_rows, dim_in)

    x_bytes = jnp.dtype(x.dtype).itemsize
    w_bytes = jnp.dtype(wT.dtype).itemsize
    out_bytes = jnp.dtype(x.dtype).itemsize
    tm = _pick_row_tile(n_rows, dim_in, dim_out, x_bytes, w_bytes, out_bytes,
                        tile, vmem_limit_bytes)

    n_pad = ((n_rows + tm - 1) // tm) * tm
    if n_pad != n_rows:
        x2 = jnp.pad(x2, ((0, n_pad - n_rows), (0, 0)))

    kernel = partial(_mp_linear_kernel, matmul_dtype=matmul_dtype)

    out = pl.pallas_call(
        kernel,
        out_shape=jax.ShapeDtypeStruct((n_pad, dim_out), x.dtype),
        grid_spec=pltpu.PrefetchScalarGridSpec(
            num_scalar_prefetch=0,
            grid=(n_pad // tm,),
            in_specs=[
                pl.BlockSpec((tm, dim_in), lambda i: (i, 0)),
                pl.BlockSpec((dim_in, dim_out), lambda i: (0, 0)),
            ],
            out_specs=pl.BlockSpec((tm, dim_out), lambda i: (i, 0)),
        ),
        compiler_params=pltpu.CompilerParams(
            dimension_semantics=("parallel",),
            vmem_limit_bytes=vmem_limit_bytes,
        ),
    )(x2, wT)

    if n_pad != n_rows:
        out = out[:n_rows]
    return out.reshape(*lead, dim_out)


# -----------------------------------------------------------------------------
# Pure-JAX reference (for a sanity check)
# -----------------------------------------------------------------------------
def mp_linear_ref(x, weight, eps=1e-4):
    norm = jnp.sqrt(jnp.sum(weight * weight, axis=-1, keepdims=True))
    w = weight / jnp.maximum(norm, eps)
    return x @ jnp.transpose(w)


if __name__ == "__main__":
    key = jax.random.PRNGKey(0)
    k_x, k_w = jax.random.split(key)

    # Small shapes consistent with the module: Linear(dim_in=32, dim_out=64)
    # applied to a (batch=2, seq=8, dim_in) activation.
    batch, seq, dim_in, dim_out = 2, 8, 32, 64

    x = jax.random.normal(k_x, (batch, seq, dim_in), dtype=jnp.float32)
    weight = jax.random.normal(k_w, (dim_out, dim_in), dtype=jnp.float32)

    ref = jax.block_until_ready(mp_linear_ref(x, weight))

    # Exact-precision path: f32 matmul, tight tolerance.
    out_f32 = jax.block_until_ready(mp_linear(x, weight, matmul_dtype=None))
    assert out_f32.shape == (batch, seq, dim_out)
    assert jnp.allclose(out_f32, ref, atol=1e-5, rtol=1e-5), "f32 mismatch vs reference"

    # Fast path: bf16 MXU inputs with f32 accumulation (relaxed tolerance).
    out_bf16 = jax.block_until_ready(mp_linear(x, weight, matmul_dtype=jnp.bfloat16))
    assert out_bf16.shape == (batch, seq, dim_out)
    assert jnp.allclose(out_bf16, ref, atol=3e-2, rtol=3e-2), "bf16 mismatch vs reference"

    print("KERNEL_OK")
</pallas_src>

<mosaic_0001>
module attributes {stable_mosaic.version = 11 : i64} {
  func.func @_mp_linear_kernel(%arg0: i32, %arg1: memref<16x32xf32, #tpu.memory_space<vmem>>, %arg2: memref<32x64xf32, #tpu.memory_space<vmem>>, %arg3: memref<16x64xf32, #tpu.memory_space<vmem>>) attributes {dimension_semantics = [#tpu.dimension_semantics<parallel>], iteration_bounds = array<i64: 1>, scalar_prefetch = 0 : i64, scratch_operands = 0 : i64, tpu.core_type = #tpu.core_type<tc>, window_params = [{transform_indices = @transform_0, window_bounds = array<i64: 16, 32>}, {pipeline_mode = #tpu.pipeline_mode<synchronous>, transform_indices = @transform_1, window_bounds = array<i64: 32, 64>}, {transform_indices = @transform_2, window_bounds = array<i64: 16, 64>}]} {
    %c0 = arith.constant 0 : index
    %c0_0 = arith.constant 0 : index
    %0 = vector.load %arg1[%c0, %c0_0] : memref<16x32xf32, #tpu.memory_space<vmem>>, vector<16x32xf32>
    %c0_1 = arith.constant 0 : index
    %c0_2 = arith.constant 0 : index
    %1 = vector.load %arg2[%c0_1, %c0_2] : memref<32x64xf32, #tpu.memory_space<vmem>>, vector<32x64xf32>
    %cst = arith.constant dense<0.000000e+00> : vector<16x64xf32>
    %2 = tpu.matmul %0, %1, %cst {dimension_numbers = #tpu.dot_dimension_numbers<[1], [0], [0], [1], [0, 0, 1, 1], [], []>} : vector<16x32xf32>, vector<32x64xf32>, vector<16x64xf32> -> vector<16x64xf32>
    %c0_3 = arith.constant 0 : index
    %c0_4 = arith.constant 0 : index
    %3 = vector.load %arg3[%c0_3, %c0_4] : memref<16x64xf32, #tpu.memory_space<vmem>>, vector<16x64xf32>
    tpu.vector_store %arg3[%c0_3, %c0_4], %2 {strides = array<i32>} : memref<16x64xf32, #tpu.memory_space<vmem>>, vector<16x64xf32>,
    return
  }
  func.func @transform_0(%arg0: i32) -> (i32, i32) {
    %c0_i32 = arith.constant 0 : i32
    %c0_i32_0 = arith.constant 0 : i32
    return %arg0, %c0_i32 : i32, i32
  }
  func.func @transform_1(%arg0: i32) -> (i32, i32) {
    %c0_i32 = arith.constant 0 : i32
    %c0_i32_0 = arith.constant 0 : i32
    %c0_i32_1 = arith.constant 0 : i32
    return %c0_i32, %c0_i32_0 : i32, i32
  }
  func.func @transform_2(%arg0: i32) -> (i32, i32) {
    %c0_i32 = arith.constant 0 : i32
    %c0_i32_0 = arith.constant 0 : i32
    return %arg0, %c0_i32 : i32, i32
  }
}

</mosaic_0001>

<bundles_post_ra>
// kernel: tpu_custom_call.1
= control target key start
LH: loop header
LB: loop body
LE: loop exit
PB: predicated region body
PF: predicated region fallthrough
CT: control target
= control target key end

     0   :  { %7 = vsyncpa [#allocation3], 0  ;;  %s279_s0 = inlined_call_operand.hbm [shape: f32[16,32], index: 0, kind: input, shape index: {}]   ;;  %s280_s1 = inlined_call_operand.hbm [shape: f32[32,64], index: 1, kind: input, shape index: {}]   ;;  %s281_s2 = inlined_call_operand.hbm [shape: f32[16,64], index: 2, kind: output, shape index: {}]  }
   0x1   :  { %8 = vsyncpa [#allocation6], 0 }
   0x2   :  { %9 = vsyncpa [#allocation4], 0  ;;  %s239_s9 = smov [#allocation2]  }
   0x3   :  { %s15_s10 = sshll.u32 %s239_s9, 4  ;;  %s16_s10 = int_to_ptr.vmem [resolvable:$true] %s15_s10 }
   0x4   :  { %s181_s11 = scalar_lea.vmem %s16_s10, 256  ;;  %p186_p1 = scmp.lt.s32.totalorder %s16_s10, %s16_s10 }
   0x5   :  { %p182_p0 = scmp.ne.s32.totalorder %s16_s10, %s181_s11  ;;  %p187_p2 = scmp.lt.s32.totalorder %s181_s11, %s181_s11 }
   0x7   :  { %p188_p3 = por %p187_p2, %p186_p1 }
   0x9   :  { %p189_p4 = pnand %p188_p3, %p182_p0 }
   0xb   :  { %192 = shalt.err (!%p189_p4)
}
   0xc   :  { %s240_s12 = smov 128   ;;  %s241_s13 = smov 8  }
   0xd   :  { %21 = dma.hbm_to_vmem [thread:$0]  %s279_s0, 256, %s16_s10, [#allocation3], %s240_s12, %s240_s12, %s241_s13  }
   0xe   :  { %s242_s16 = smov [#allocation5]  }
   0xf   :  { %s27_s17 = sshll.u32 %s242_s16, 4  ;;  %s28_s17 = int_to_ptr.vmem [resolvable:$true] %s27_s17 }
  0x10   :  { %s201_s18 = scalar_lea.vmem %s28_s17, 512  ;;  %p206_p6 = scmp.lt.s32.totalorder %s28_s17, %s28_s17 }
  0x11   :  { %p202_p5 = scmp.ne.s32.totalorder %s28_s17, %s201_s18  ;;  %p207_p7 = scmp.lt.s32.totalorder %s201_s18, %s201_s18 }
  0x13   :  { %p208_p8 = por %p207_p7, %p206_p6 }
  0x15   :  { %p209_p9 = pnand %p208_p8, %p202_p5 }
  0x17   :  { %212 = shalt.err (!%p209_p9)
}
  0x18   :  { %33 = dma.hbm_to_vmem [thread:$0]  %s280_s1, 512, %s28_s17, [#allocation6], %s240_s12, %s240_s12, %s241_s13  }
  0x19   :  { %233 = dma.done.wait [#allocation3], 256  }
  0x1a   :  { %234 = vsyncadd [#allocation3], 4294967040 }
  0x1b   :  { %235 = dma.done.wait [#allocation6], 512  }
  0x1c   :  { %236 = vsyncadd [#allocation6], 4294966784  ;;  %vm46_vm0 = vcmask 261120   ;;  %v45_v0 = vld [vmem:[#allocation5 + $0x18] sm:$0xff]  ;;  %v44_v1 = vld [vmem:[#allocation5 + $0x10] sm:$0xff]  ;;  %vm128_vm1 = vcmask 523264  }
  0x1d   :  { %157 = vmatprep.subr.mxu0 %v45_v0  ;;  %v40_v2 = vld [vmem:[#allocation2] sm:$0xff]  ;;  %v43_v3 = vld [vmem:[#allocation5 + $0x8] sm:$0xff]  ;;  %v42_v4 = vld [vmem:[#allocation5] sm:$0xff]  ;;  %s243_s0 = smov [#allocation7]  }
  0x1e   :  { %158 = vmatpush3.msra.mxu0 %v45_v0  ;;  %165 = vmatprep.mubr.msk.f32.mxu0 %vm46_vm0, %v40_v2  ;;  %v41_v5 = vld [vmem:[#allocation2 + $0x8] sm:$0xff]  ;;  %s136_s1 = sshll.u32 %s243_s0, 4  ;;  %s137_s1 = int_to_ptr.vmem [resolvable:$true] %s136_s1 }
  0x1f   :  { %159 = vmatprep.subr.mxu0 %v44_v1  ;;  %s213_s21 = scalar_lea.vmem %s137_s1, 256  ;;  %p218_p11 = scmp.lt.s32.totalorder %s137_s1, %s137_s1 }
  0x20   :  { %160 = vmatpush3.msra.mxu0 %v44_v1  ;;  %p214_p10 = scmp.ne.s32.totalorder %s137_s1, %s213_s21  ;;  %p219_p12 = scmp.lt.s32.totalorder %s213_s21, %s213_s21 }
  0x21   :  { %161 = vmatprep.subr.mxu0 %v43_v3 }
  0x22   :  { %162 = vmatpush3.msra.mxu0 %v43_v3  ;;  %p220_p13 = por %p219_p12, %p218_p11 }
  0x23   :  { %163 = vmatprep.subr.mxu0 %v42_v4 }
  0x24   :  { %164 = vmatpush3.msra.mxu0 %v42_v4  ;;  %p221_p0 = pnand %p220_p13, %p214_p10 }
  0x25   :  { %166 = vmatmul.mubr.msk.f32.vlgmr.msra.gmra.mxu0 %vm46_vm0, %v41_v5 }
  0xe5   :  { %v167_v6 = vpop.f32.mrf.mxu0 }
  0xe6   :  { %130 = vst.msk [vmem:[#allocation7 + $0x8] sm:$0xff] %vm128_vm1, %v167_v6 }
  0xe7   :  { %v119_v7 = vpop.f32.mrf.mxu0 }
  0xe8   :  { %129 = vst.msk [vmem:[#allocation7] sm:$0xff] %vm128_vm1, %v119_v7 }
  0xe9   :  { %224 = shalt.err (!%p221_p0)
}
  0xea   :  { %142 = dma.vmem_to_hbm [thread:$0]  %s137_s1, 256, %s281_s2, [#allocation4], %s240_s12, %s240_s12, %s241_s13  }
  0xeb   :  { %237 = dma.done.wait [#allocation4], 256  }
  0xec   :  { %238 = vsyncadd [#allocation4], 4294967040 }
  0xed   :  { %146 = vsyncpa [#allocation3], 1 }
  0xee   :  { %147 = vsyncpa [#allocation6], 1 }
  0xef   :  { %148 = vsyncpa [#allocation4], 1 }

</bundles_post_ra>
